<compile_context>
chip_gen: v7x
topology: tpu7x:2x2x1
jax: 0.10.0
libtpu: 0.0.40
codegen_flags: <defaults>
</compile_context>

<pallas_src>
import functools
import math

import jax
import jax.numpy as jnp
from jax.experimental import pallas as pl
from jax.experimental.pallas import tpu as pltpu

EPS = 1e-5
LOG_EPS = math.log(EPS)


def _ce2d_kernel(out_ref, lab_ref, loss_ref, acc_ref, *,
                 inv_n, n_pix, tile_p, needs_mask):
    b = pl.program_id(0)
    p = pl.program_id(1)

    @pl.when((b == 0) & (p == 0))
    def _():
        acc_ref[...] = jnp.zeros_like(acc_ref)

    # (C, TILE_P): classes on sublanes, pixels on lanes (fully dense vregs).
    x = out_ref[0].astype(jnp.float32)
    y = lab_ref[0].astype(jnp.float32)

    if needs_mask:
        # Ragged last pixel tile: zero out the out-of-range lanes in-kernel
        # (no jnp.pad of the full inputs in the wrapper).
        lane = jax.lax.broadcasted_iota(jnp.int32, x.shape, dimension=1)
        valid = lane < (n_pix - p * tile_p)
        x = jnp.where(valid, x, 0.0)
        y = jnp.where(valid, y, 0.0)  # y == 0 => zero contribution

    # log-softmax along the class axis (sublanes); fewer transcendentals than
    # softmax -> reciprocal -> log, and numerically cleaner.
    m = jnp.max(x, axis=0, keepdims=True)                                 # (1, T)
    lse = m + jnp.log(jnp.sum(jnp.exp(x - m), axis=0, keepdims=True))     # (1, T)
    log_p = x - lse                                                       # (C, T)
    # masked_fill(p < 1e-5, 1) then log  <=>  log_p < log(1e-5) -> 0
    log_p = jnp.where(log_p < LOG_EPS, 0.0, log_p)

    # labels: masked_fill(y < 1e-5, 1) then log
    log_y = jnp.log(jnp.where(y < EPS, 1.0, y))

    # loss = -sum((log_p - log_y) * y) / N  ==  sum((log_y - log_p) * y) / N
    # Steady state: pure element-wise VPU add into the vector accumulator.
    acc_ref[...] += (log_y - log_p) * y

    @pl.when((b == pl.num_programs(0) - 1) & (p == pl.num_programs(1) - 1))
    def _():
        tot = jnp.sum(acc_ref[...], axis=1, keepdims=True)   # (C, 1)
        tot = jnp.sum(tot, axis=0, keepdims=True)            # (1, 1)
        loss_ref[...] = tot * inv_n


def cross_entropy_loss_2d(outputs, labels, *, max_tile_pixels=32768):
    """outputs, labels: (B, n_cls, H, W) float arrays. Returns scalar loss."""
    B, C, H, W = outputs.shape
    P = H * W
    N = B * P

    # NCHW -> (B, C, H*W): free, contiguous reshape (no transpose, no pad).
    out3 = outputs.reshape(B, C, P)
    lab3 = labels.reshape(B, C, P)

    # Pixel tile: ~<= 1 MiB of f32 per input block (fits scoped VMEM on
    # v5e/v6e/v7x with double buffering), multiple of 128 lanes, or the full
    # pixel extent if that is already small enough.
    budget = max(128, min(max_tile_pixels, (1 << 20) // (4 * C)))
    budget = max(128, (budget // 128) * 128)
    tile_p = P if P <= budget else budget
    n_ptiles = pl.cdiv(P, tile_p)
    needs_mask = (P % tile_p) != 0

    kernel = functools.partial(
        _ce2d_kernel,
        inv_n=1.0 / float(N),
        n_pix=P,
        tile_p=tile_p,
        needs_mask=needs_mask,
    )

    loss = pl.pallas_call(
        kernel,
        out_shape=jax.ShapeDtypeStruct((1, 1), jnp.float32),
        grid_spec=pltpu.PrefetchScalarGridSpec(
            num_scalar_prefetch=0,
            grid=(B, n_ptiles),
            in_specs=[
                pl.BlockSpec((1, C, tile_p), lambda b, p: (b, 0, p)),
                pl.BlockSpec((1, C, tile_p), lambda b, p: (b, 0, p)),
            ],
            out_specs=pl.BlockSpec((1, 1), lambda b, p: (0, 0)),
            scratch_shapes=[pltpu.VMEM((C, tile_p), jnp.float32)],
        ),
        # TODO(synk): on v7x the pixel range could additionally be split across
        # the two TensorCores (parallel leading axis + per-core partial sums);
        # kept sequential here so the single scratch accumulator stays correct.
        compiler_params=pltpu.CompilerParams(
            dimension_semantics=("arbitrary", "arbitrary"),
        ),
    )(out3, lab3)

    return loss[0, 0]


def _reference(outputs, labels):
    """Pure-JAX reference mirroring the PyTorch forward exactly."""
    B, C, H, W = outputs.shape
    x = jnp.transpose(outputs, (0, 2, 3, 1)).reshape(B * H * W, C)
    y = jnp.transpose(labels, (0, 2, 3, 1)).reshape(B * H * W, C)
    p = jax.nn.softmax(x, axis=1)
    log_p = jnp.log(jnp.where(p < EPS, 1.0, p))
    log_y = jnp.log(jnp.where(y < EPS, 1.0, y))
    return -jnp.sum((log_p - log_y) * y) / (B * H * W)


if __name__ == "__main__":
    key = jax.random.PRNGKey(0)
    k1, k2 = jax.random.split(key)

    B, C, H, W = 2, 4, 16, 16
    outputs = jax.random.normal(k1, (B, C, H, W), dtype=jnp.float32)
    # soft labels: a probability distribution over classes at each pixel
    labels = jax.nn.softmax(
        jax.random.normal(k2, (B, C, H, W), dtype=jnp.float32), axis=1
    )

    loss = jax.block_until_ready(cross_entropy_loss_2d(outputs, labels))
    ref = jax.block_until_ready(_reference(outputs, labels))

    assert jnp.allclose(loss, ref, rtol=1e-5, atol=1e-5), (loss, ref)
    print("KERNEL_OK")
</pallas_src>

<mosaic_0001>
module attributes {stable_mosaic.version = 11 : i64} {
  func.func @_ce2d_kernel(%arg0: i32, %arg1: i32, %arg2: memref<1x4x256xf32, #tpu.memory_space<vmem>>, %arg3: memref<1x4x256xf32, #tpu.memory_space<vmem>>, %arg4: memref<1x1xf32, #tpu.memory_space<vmem>>, %arg5: memref<4x256xf32, #tpu.memory_space<vmem>>) attributes {dimension_semantics = [#tpu.dimension_semantics<arbitrary>, #tpu.dimension_semantics<arbitrary>], iteration_bounds = array<i64: 2, 1>, scalar_prefetch = 0 : i64, scratch_operands = 1 : i64, tpu.core_type = #tpu.core_type<tc>, window_params = [{transform_indices = @transform_0, window_bounds = array<i64: 1, 4, 256>}, {transform_indices = @transform_1, window_bounds = array<i64: 1, 4, 256>}, {pipeline_mode = #tpu.pipeline_mode<synchronous>, transform_indices = @transform_2, window_bounds = array<i64: 1, 1>}]} {
    %c0_i32 = arith.constant 0 : i32
    %0 = arith.cmpi eq, %arg0, %c0_i32 : i32
    %c0_i32_0 = arith.constant 0 : i32
    %1 = arith.cmpi eq, %arg1, %c0_i32_0 : i32
    %2 = arith.andi %0, %1 : i1
    %3 = arith.extui %2 : i1 to i32
    %c0_i32_1 = arith.constant 0 : i32
    %4 = arith.cmpi ne, %3, %c0_i32_1 : i32
    scf.if %4 {
      %cst_18 = arith.constant 0.000000e+00 : f32
      %39 = vector.broadcast %cst_18 : f32 to vector<4x256xf32>
      %c0_19 = arith.constant 0 : index
      %c0_20 = arith.constant 0 : index
      %40 = vector.load %arg5[%c0_19, %c0_20] : memref<4x256xf32, #tpu.memory_space<vmem>>, vector<4x256xf32>
      tpu.vector_store %arg5[%c0_19, %c0_20], %39 {strides = array<i32>} : memref<4x256xf32, #tpu.memory_space<vmem>>, vector<4x256xf32>,
    } else {
    }
    %c0 = arith.constant 0 : index
    %c0_2 = arith.constant 0 : index
    %c0_3 = arith.constant 0 : index
    %5 = vector.load %arg2[%c0, %c0_2, %c0_3] : memref<1x4x256xf32, #tpu.memory_space<vmem>>, vector<1x4x256xf32>
    %6 = vector.shape_cast %5 : vector<1x4x256xf32> to vector<4x256xf32>
    %c0_4 = arith.constant 0 : index
    %c0_5 = arith.constant 0 : index
    %c0_6 = arith.constant 0 : index
    %7 = vector.load %arg3[%c0_4, %c0_5, %c0_6] : memref<1x4x256xf32, #tpu.memory_space<vmem>>, vector<1x4x256xf32>
    %8 = vector.shape_cast %7 : vector<1x4x256xf32> to vector<4x256xf32>
    %cst = arith.constant dense<0xFF800000> : vector<256xf32>
    %9 = vector.multi_reduction <maximumf>, %6, %cst [0] : vector<4x256xf32> to vector<256xf32>
    %10 = vector.shape_cast %9 : vector<256xf32> to vector<1x256xf32>
    %11 = vector.broadcast %10 : vector<1x256xf32> to vector<4x256xf32>
    %12 = arith.subf %6, %11 : vector<4x256xf32>
    %13 = math.exp %12 : vector<4x256xf32>
    %cst_7 = arith.constant dense<0.000000e+00> : vector<256xf32>
    %14 = vector.multi_reduction <add>, %13, %cst_7 [0] : vector<4x256xf32> to vector<256xf32>
    %15 = vector.shape_cast %14 : vector<256xf32> to vector<1x256xf32>
    %16 = math.log %15 : vector<1x256xf32>
    %17 = arith.addf %10, %16 : vector<1x256xf32>
    %18 = vector.broadcast %17 : vector<1x256xf32> to vector<4x256xf32>
    %19 = arith.subf %6, %18 : vector<4x256xf32>
    %cst_8 = arith.constant -11.5129251 : f32
    %20 = vector.broadcast %cst_8 : f32 to vector<4x256xf32>
    %21 = arith.cmpf olt, %19, %20 : vector<4x256xf32>
    %cst_9 = arith.constant 0.000000e+00 : f32
    %22 = vector.broadcast %cst_9 : f32 to vector<4x256xf32>
    %23 = arith.select %21, %22, %19 : vector<4x256xi1>, vector<4x256xf32>
    %cst_10 = arith.constant 9.99999974E-6 : f32
    %24 = vector.broadcast %cst_10 : f32 to vector<4x256xf32>
    %25 = arith.cmpf olt, %8, %24 : vector<4x256xf32>
    %cst_11 = arith.constant 1.000000e+00 : f32
    %26 = vector.broadcast %cst_11 : f32 to vector<4x256xf32>
    %27 = arith.select %25, %26, %8 : vector<4x256xi1>, vector<4x256xf32>
    %28 = math.log %27 : vector<4x256xf32>
    %c0_12 = arith.constant 0 : index
    %c0_13 = arith.constant 0 : index
    %29 = vector.load %arg5[%c0_12, %c0_13] : memref<4x256xf32, #tpu.memory_space<vmem>>, vector<4x256xf32>
    %30 = arith.subf %28, %23 : vector<4x256xf32>
    %31 = arith.mulf %30, %8 : vector<4x256xf32>
    %32 = arith.addf %29, %31 : vector<4x256xf32>
    %c0_14 = arith.constant 0 : index
    %c0_15 = arith.constant 0 : index
    %33 = vector.load %arg5[%c0_14, %c0_15] : memref<4x256xf32, #tpu.memory_space<vmem>>, vector<4x256xf32>
    tpu.vector_store %arg5[%c0_14, %c0_15], %32 {strides = array<i32>} : memref<4x256xf32, #tpu.memory_space<vmem>>, vector<4x256xf32>,
    %c1_i32 = arith.constant 1 : i32
    %34 = arith.cmpi eq, %arg0, %c1_i32 : i32
    %c0_i32_16 = arith.constant 0 : i32
    %35 = arith.cmpi eq, %arg1, %c0_i32_16 : i32
    %36 = arith.andi %34, %35 : i1
    %37 = arith.extui %36 : i1 to i32
    %c0_i32_17 = arith.constant 0 : i32
    %38 = arith.cmpi ne, %37, %c0_i32_17 : i32
    scf.if %38 {
      %c0_18 = arith.constant 0 : index
      %c0_19 = arith.constant 0 : index
      %39 = vector.load %arg5[%c0_18, %c0_19] : memref<4x256xf32, #tpu.memory_space<vmem>>, vector<4x256xf32>
      %cst_20 = arith.constant dense<0.000000e+00> : vector<4xf32>
      %40 = vector.multi_reduction <add>, %39, %cst_20 [1] : vector<4x256xf32> to vector<4xf32>
      %41 = vector.shape_cast %40 : vector<4xf32> to vector<4x1xf32>
      %cst_21 = arith.constant dense<0.000000e+00> : vector<1xf32>
      %42 = vector.multi_reduction <add>, %41, %cst_21 [0] : vector<4x1xf32> to vector<1xf32>
      %43 = vector.shape_cast %42 : vector<1xf32> to vector<1x1xf32>
      %cst_22 = arith.constant 0.001953125 : f32
      %44 = vector.broadcast %cst_22 : f32 to vector<1x1xf32>
      %45 = arith.mulf %43, %44 : vector<1x1xf32>
      %c0_23 = arith.constant 0 : index
      %c0_24 = arith.constant 0 : index
      %46 = vector.load %arg4[%c0_23, %c0_24] : memref<1x1xf32, #tpu.memory_space<vmem>>, vector<1x1xf32>
      tpu.vector_store %arg4[%c0_23, %c0_24], %45 {strides = array<i32>} : memref<1x1xf32, #tpu.memory_space<vmem>>, vector<1x1xf32>,
    } else {
    }
    return
  }
  func.func @transform_0(%arg0: i32, %arg1: i32) -> (i32, i32, i32) {
    %c0_i32 = arith.constant 0 : i32
    %c0_i32_0 = arith.constant 0 : i32
    return %arg0, %c0_i32, %arg1 : i32, i32, i32
  }
  func.func @transform_1(%arg0: i32, %arg1: i32) -> (i32, i32, i32) {
    %c0_i32 = arith.constant 0 : i32
    %c0_i32_0 = arith.constant 0 : i32
    return %arg0, %c0_i32, %arg1 : i32, i32, i32
  }
  func.func @transform_2(%arg0: i32, %arg1: i32) -> (i32, i32) {
    %c0_i32 = arith.constant 0 : i32
    %c0_i32_0 = arith.constant 0 : i32
    %c0_i32_1 = arith.constant 0 : i32
    return %c0_i32, %c0_i32_0 : i32, i32
  }
}

</mosaic_0001>

<bundles_post_ra>
// kernel: tpu_custom_call.1
= control target key start
LH: loop header
LB: loop body
LE: loop exit
PB: predicated region body
PF: predicated region fallthrough
CT: control target
= control target key end

     0   :  { %7 = vsyncpa [#allocation4], 0  ;;  %s876_s0 = inlined_call_operand.hbm [shape: f32[2,4,256], index: 0, kind: input, shape index: {}]   ;;  %s877_s1 = inlined_call_operand.hbm [shape: f32[2,4,256], index: 1, kind: input, shape index: {}]   ;;  %s878_s2 = inlined_call_operand.hbm [shape: f32[1,1], index: 2, kind: output, shape index: {}]  }
   0x1   :  { %9 = vsyncpa [#allocation4 + $0x1], 0 }
   0x2   :  { %10 = vsyncpa [#allocation7], 0 }
   0x3   :  { %12 = vsyncpa [#allocation7 + $0x1], 0 }
   0x4   :  { %13 = vsyncpa [#allocation5], 0  ;;  %s665_s9 = smov 0   ;;  %s667_s10 = smov 0  }
   0x5   :  { %s669_s11 = smov 0   ;;  %s671_s12 = smov 0  }
   0x6   :  { %s673_s13 = smov 0   ;;  %s675_s14 = smov 0  }
   0x7 LB: > { %s400_s15 = sadd.s32 4294967295, %s644_s14   ;;  %s31_s16 = sadd.s32 1, %s640_s13  ;;  %s644_s14 = sphi %s675_s14, %s19_s14   ;;  %s640_s13 = sphi %s673_s13, %s893_s13   ;;  %s636_s12 = sphi %s671_s12, %s892_s12   ;;  %s632_s11 = sphi %s669_s11, %s891_s11   ;;  %s628_s10 = sphi %s667_s10, %s890_s10   ;;  %s624_s9 = sphi %s665_s9, %s889_s9  }
   0x8   : > { %p33_p0 = scmp.ge.s32.totalorder %s31_s16, 2  ;;  %s40_s17 = sadd.s32 1, %s632_s11 }
   0x9   : > { %p47_p1 = scmp.ne.s32.totalorder %s632_s11, %s628_s10  ;;  %p48_p2 = scmp.eq.s32.totalorder %s644_s14, 0 }
   0xa   : > { %s895_s16 = smov (%p33_p0, %s31_s16), 0  ;;  %p53_p4 = scmp.ne.s32.totalorder %s628_s10, %s624_s9 }
   0xb   : > { %p701_p3 = por %p48_p2, %p47_p1  ;;  %s35_s19 = ssub.s32 %s640_s13, %s895_s16 }
   0xc   : > { %p54_p5 = scmp.eq.s32.totalorder %s400_s15, 0  ;;  %p38_p6 = scmp.eq.s32.totalorder %s35_s19, 0 }
   0xd   : > { %p437_p8 = scmp.lt.s32.totalorder %s644_s14, 2  ;;  %s719_s22 = sand.u32 1, %s632_s11  }
   0xe   : > { %p710_p7 = por %p54_p5, %p53_p4  ;;  %s418_s23 = sshll.u32 %s640_s13, 7 }
   0xf   : > { %s716_s21 = scalar_select %p38_p6, %s632_s11, %s40_s17  }
  0x10   : > { %s881_s20 = scalar_select %p710_p7, 1, 0 }
  0x11   : > { %s403_s24 = sshll.u32 %s719_s22, 3  ;;  %s728_s27 = scalar_lea.hbm %s876_s0, %s418_s23 }
  0x12   : > { %s130_s28 = scalar_lea.vmem [#allocation3], %s403_s24  ;;  %p734_p9 = pnand %p437_p8, %p701_p3 }
  0x13   : > { %s140_s29 = sshll.u32 %s130_s28, 4  ;;  %s127_s3 = scalar_lea.sflag [#allocation4], %s719_s22  ;;  %s738_s29 = int_to_ptr.vmem [resolvable:$true] %s140_s29 }
  0x14   : > { %s500_s4 = scalar_lea.hbm %s728_s27, 128  ;;  %p502_p13 = pneg %p734_p9 }
  0x15   : > { %p501_p12 = scmp.ne.s32.totalorder %s728_s27, %s500_s4  ;;  %s505_s7 = scalar_lea.hbm %s876_s0, 256 }
  0x16   : > { %p506_p2 = scmp.lt.u32.totalorder %s728_s27, %s876_s0  ;;  %p507_p3 = scmp.lt.u32.totalorder %s505_s7, %s500_s4 }
  0x17   : > { %p503_p0 = pnand %p502_p13, %p501_p12  ;;  %p509_p5 = scmp.lt.u32.totalorder %s500_s4, %s728_s27 }
  0x18   : > { %p508_p4 = por %p507_p3, %p506_p2 }
  0x19   : > { %p504_p1 = pneg %p503_p0 }
  0x1a   : > { %p510_p6 = por %p509_p5, %p508_p4 }
  0x1c   : > { %p511_p8 = pnand %p510_p6, %p504_p1 }
  0x1e   : > { %514 = shalt.err (!%p511_p8)
}
  0x1f   : > { %s515_s17 = scalar_lea.vmem %s738_s29, 128  ;;  %s646_s18 = smov [#allocation3]  }
  0x20   : > { %p516_p12 = scmp.ne.s32.totalorder %s738_s29, %s515_s17  ;;  %s520_s19 = sshll.u32 %s646_s18, 4  ;;  %s521_s19 = int_to_ptr.vmem [resolvable:$false] %s520_s19 }
  0x21   : > { %s522_s25 = scalar_lea.vmem %s521_s19, 256  ;;  %p523_p11 = scmp.lt.s32.totalorder %s738_s29, %s521_s19 }
  0x22   : > { %p518_p0 = pnand %p516_p12, %p502_p13  ;;  %p524_p2 = scmp.lt.s32.totalorder %s522_s25, %s515_s17 }
  0x24   : > { %p519_p10 = pneg %p518_p0  ;;  %p525_p3 = por %p524_p2, %p523_p11 }
  0x26   : > { %p526_p4 = pnand %p525_p3, %p519_p10 }
  0x28   : > { %529 = shalt.err (!%p526_p4)
}
  0x29   : > { %433 = dma.hbm_to_vmem [thread:$0]  (!%p734_p9), %s728_s27, 128, %s738_s29, %s127_s3  }
  0x2a   : > { %p883_p1 = scmp.lt.s32.totalorder %s644_s14, 3  ;;  %p884_p5 = scmp.ge.s32.totalorder %s644_s14, 1 }
  0x2b   : > { %s781_s5 = scalar_lea.hbm %s877_s1, %s418_s23  ;;  %s151_s6 = scalar_lea.vmem [#allocation6], %s403_s24 }
  0x2c   : > { %p772_p6 = pnand %p884_p5, %p883_p1  ;;  %s161_s7 = sshll.u32 %s151_s6, 4  ;;  %s162_s7 = int_to_ptr.vmem [resolvable:$true] %s161_s7 }
  0x2d   : > { %s148_s27 = scalar_lea.sflag [#allocation7], %s719_s22  ;;  %s530_s29 = scalar_lea.hbm %s781_s5, 128 }
  0x2e   : > { %s885_s26 = scalar_select %p772_p6, 1, 0 }
  0x2f   : > { %p531_p10 = scmp.ne.s32.totalorder %s781_s5, %s530_s29  ;;  %s535_s23 = scalar_lea.hbm %s877_s1, 256 }
  0x30   : > { %p536_p12 = scmp.lt.u32.totalorder %s781_s5, %s877_s1  ;;  %p537_p0 = scmp.lt.u32.totalorder %s535_s23, %s530_s29 }
  0x31   : > { %p533_p11 = pnand %p531_p10, %p502_p13  ;;  %p539_p3 = scmp.lt.u32.totalorder %s530_s29, %s781_s5 }
  0x32   : > { %p538_p2 = por %p537_p0, %p536_p12 }
  0x33   : > { %p534_p8 = pneg %p533_p11 }
  0x34   : > { %p540_p4 = por %p539_p3, %p538_p2 }
  0x36   : > { %p541_p1 = pnand %p540_p4, %p534_p8 }
  0x38   : > { %544 = shalt.err (!%p541_p1)
}
  0x39   : > { %s545_s22 = scalar_lea.vmem %s162_s7, 128  ;;  %s647_s24 = smov [#allocation6]  }
  0x3a   : > { %p546_p5 = scmp.ne.s32.totalorder %s162_s7, %s545_s22  ;;  %s550_s18 = sshll.u32 %s647_s24, 4  ;;  %s551_s18 = int_to_ptr.vmem [resolvable:$false] %s550_s18 }
  0x3b   : > { %s552_s19 = scalar_lea.vmem %s551_s18, 256  ;;  %p553_p7 = scmp.lt.s32.totalorder %s162_s7, %s551_s18 }
  0x3c   : > { %p548_p10 = pnand %p546_p5, %p502_p13  ;;  %p554_p6 = scmp.lt.s32.totalorder %s552_s19, %s545_s22 }
  0x3e   : > { %p549_p11 = pneg %p548_p10  ;;  %p555_p0 = por %p554_p6, %p553_p7 }
  0x40   : > { %p556_p12 = pnand %p555_p0, %p549_p11 }
  0x42   : > { %559 = shalt.err (!%p556_p12)
}
  0x43   : > { %436 = dma.hbm_to_vmem [thread:$0]  (!%p734_p9), %s781_s5, 128, %s162_s7, %s148_s27  }
  0x44   : > { %p886_p8 = scmp.ne.s32.totalorder %s885_s26, 0 }
  0x45   : > { %s172_s25 = sand.u32 (!%p886_p8), 1, %s628_s10   ;;  %p887_p13 = scmp.ne.s32.totalorder (!%p886_p8), %s881_s20, 0 }
  0x46   : > { %170 = sbr.rel (%p886_p8) target bundleno = 360 (0x168), region = 28  ;;  %s410_s28 = sshll.u32 (!%p886_p8), %s172_s25, 3 }
  0x47   : > { %s173_s4 = scalar_lea.sflag (!%p886_p8), [#allocation4], %s172_s25  ;;  %s176_s6 = scalar_lea.vmem (!%p886_p8), [#allocation3], %s410_s28 }
  0x4d   : > { %611 = dma.done.wait (%p887_p13), %s173_s4, 128  }
  0x4e   : > { %613 = vsyncadd (%p887_p13), %s173_s4, 4294967168  ;;  %s182_s29 = scalar_lea.sflag [#allocation7], %s172_s25  ;;  %s812_s3 = scalar_lea.vmem [#allocation6], %s410_s28 }
  0x4f   : > { %615 = dma.done.wait (%p887_p13), %s182_s29, 128  }
  0x50   : > { %617 = vsyncadd (%p887_p13), %s182_s29, 4294967168  ;;  %p208_p7 = scmp.eq.s32.totalorder %s636_s12, 0 }
  0x51   : > { %v648_v0 = vmov (%p208_p7), 0.0  }
  0x52   : > { %213 = sbr.rel (!%p208_p7) target bundleno = 89 (0x59), region = 40  ;;  %214 = vst [vmem:[#allocation2] sm:$0xff] (%p208_p7), %v648_v0 }
  0x59 PF: > { %v215_v1 = vld [vmem:[%s176_s6] sm:$0xff]  ;;  %vm220_vm0 = vcmask 1043456   ;;  %p281_p9 = scmp.eq.s32.totalorder %s636_s12, 1  ;;  %v216_v33 = vld [vmem:[%s812_s3] sm:$0xff] }
  0x5a   : > { %v218_v2 = vcombine.high %v215_v1, %v215_v1  ;;  %v221_v3 = vsel %vm220_vm0, %v215_v1, -inf  ;;  %vm272_vm1 = vcmp.lt.f32.partialorder %v216_v33, 1e-05  ;;  %v276_v50 = vld [vmem:[#allocation2] sm:$0xff]  ;;  %vm303_vm3 = vcmask (%p281_p9), 0  }
  0x5b   : > { %v222_v4 = vrot.slane %v221_v3, 4  ;;  %v273_v37 = vsel %vm272_vm1, 1.0, %v216_v33 }
  0x5c   : > { %v228_v5 = vsel %vm220_vm0, %v218_v2, -inf }
  0x5d   : > { %v223_v6 = vmax.f32 %v221_v3, %v222_v4  ;;  %v229_v7 = vrot.slane %v228_v5, 4 }
  0x5f   : > { %v224_v8 = vrot.slane %v223_v6, 2  ;;  %v230_v9 = vmax.f32 %v228_v5, %v229_v7 }
  0x61   : > { %v225_v10 = vmax.f32 %v223_v6, %v224_v8  ;;  %v231_v11 = vrot.slane %v230_v9, 2 }
  0x63   : > { %v226_v12 = vrot.slane %v225_v10, 1  ;;  %v232_v13 = vmax.f32 %v230_v9, %v231_v11 }
  0x65   : > { %v227_v14 = vmax.f32 %v225_v10, %v226_v12  ;;  %v233_v15 = vrot.slane %v232_v13, 1 }
  0x67   : > { %v234_v16 = vmax.f32 %v232_v13, %v233_v15 }
  0x69   : > { %v237_v17 = vcombine.low %v227_v14, %v234_v16 }
  0x6b   : > { %v239_v18 = vsub.f32 %v215_v1, %v237_v17 }
  0x6d   : > { %v240_v19 = vmul.f32 1.442695, %v239_v18 }
  0x6f   : > { %491 = vpow2.f32 %v240_v19 }
  0x79   : > { %v492_v20 = vpop.eup %491 }
  0x7a   : > { %v243_v21 = vcombine.high %v492_v20, %v492_v20  ;;  %v245_v22 = vsel %vm220_vm0, %v492_v20, 0.0 }
  0x7b   : > { %v246_v23 = vrot.slane %v245_v22, 4 }
  0x7c   : > { %v252_v24 = vsel %vm220_vm0, %v243_v21, 0.0 }
  0x7d   : > { %v247_v25 = vadd.f32 %v246_v23, %v245_v22  ;;  %v253_v26 = vrot.slane %v252_v24, 4 }
  0x7f   : > { %v248_v27 = vrot.slane %v247_v25, 2  ;;  %v254_v28 = vadd.f32 %v253_v26, %v252_v24 }
  0x81   : > { %v249_v29 = vadd.f32 %v248_v27, %v247_v25  ;;  %v255_v30 = vrot.slane %v254_v28, 2 }
  0x83   : > { %v250_v31 = vrot.slane %v249_v29, 1  ;;  %v256_v32 = vadd.f32 %v255_v30, %v254_v28 }
  0x85   : > { %v251_v34 = vadd.f32 %v250_v31, %v249_v29  ;;  %v257_v35 = vrot.slane %v256_v32, 1 }
  0x87   : > { %v258_v36 = vadd.f32 %v257_v35, %v256_v32  ;;  %493 = vlog2.f32 %v251_v34 }
  0x89   : > { %495 = vlog2.f32 %v258_v36 }
  0x8a   : > { %497 = vlog2.f32 %v273_v37 }
  0x91   : > { %v494_v38 = vpop.eup %493 }
  0x92   : > { %v260_v39 = vmul.f32 0.6931472, %v494_v38 }
  0x93   : > { %v496_v40 = vpop.eup %495 }
  0x94   : > { %v262_v41 = vmul.f32 0.6931472, %v496_v40  ;;  %v263_v42 = vadd.f32 %v260_v39, %v227_v14  ;;  %v498_v44 = vpop.eup %497 }
  0x95   : > { %v275_v47 = vmul.f32 0.6931472, %v498_v44 }
  0x96   : > { %v264_v43 = vadd.f32 %v262_v41, %v234_v16 }
  0x98   : > { %v267_v45 = vcombine.low %v263_v42, %v264_v43 }
  0x9a   : > { %v269_v46 = vsub.f32 %v215_v1, %v267_v45 }
  0x9c   : > { %vm270_vm2 = vcmp.lt.f32.partialorder %v269_v46, -11.512925 }
  0x9d   : > { %v271_v48 = vsel %vm270_vm2, 0.0, %v269_v46 }
  0x9e   : > { %v277_v49 = vsub.f32 %v275_v47, %v271_v48  ;;  %285 = sbr.rel (!%p281_p9) target bundleno = 335 (0x14f), region = 44 }
  0xa0   : > { %v278_v51 = vmul.f32 %v277_v49, %v216_v33 }
  0xa2   : > { %v279_v52 = vadd.f32 %v278_v51, %v276_v50 }
  0xa4   : > { %280 = vst [vmem:[#allocation2] sm:$0xff] %v279_v52 }
  0xab   : > { %v286_v53 = vld [vmem:[#allocation2] sm:$0xff] }
  0xac   : > { %v288_v54 = vcombine.high %v286_v53, %v286_v53  ;;  %v290_v55 = vsel %vm220_vm0, %v286_v53, 0.0 }
  0xae   : > { %v291_v56 = vsel %vm220_vm0, %v288_v54, 0.0 }
  0xaf   : > { %v292_v57 = vadd.f32 %v291_v56, %v290_v55 }
  0xb1   : > { %293 = vadd.xlane.f32.xlu0 %v292_v57 }
 0x13e   : > { %v294_v58 = vpop.xlane.xlu0 %293 }
 0x13f   : > { %v295_v59 = vsel %vm220_vm0, %v294_v58, 0.0 }
 0x140   : > { %v296_v60 = vrot.slane %v295_v59, 4 }
 0x142   : > { %v297_v61 = vadd.f32 %v296_v60, %v295_v59 }
 0x144   : > { %v298_v62 = vrot.slane %v297_v61, 2 }
 0x146   : > { %v299_v63 = vadd.f32 %v298_v62, %v297_v61 }
 0x148   : > { %v300_v0 = vrot.slane %v299_v63, 1 }
 0x14a   : > { %v301_v1 = vadd.f32 %v300_v0, %v299_v63 }
 0x14c   : > { %v302_v2 = vmul.f32 0.001953125, %v301_v1 }
 0x14e   : > { %304 = vst.msk [vmem:[#allocation8] sm:$0x1] %vm303_vm3, %v302_v2 }
 0x14f PF: > { %p832_p6 = scmp.eq.s32.totalorder %s400_s15, 1  ;;  %s649_s20 = smov [#allocation8]  }
 0x150   : > { %s312_s30 = sshll.u32 %s649_s20, 4  ;;  %s313_s30 = int_to_ptr.vmem [resolvable:$true] %s312_s30 }
 0x151   : > { %s560_s26 = scalar_lea.vmem %s313_s30, 16  ;;  %s566_s5 = scalar_lea.vmem %s313_s30, 32 }
 0x152   : > { %p561_p2 = scmp.ne.s32.totalorder %s313_s30, %s560_s26  ;;  %p567_p1 = scmp.lt.s32.totalorder %s313_s30, %s313_s30 }
 0x153   : > { %p568_p5 = scmp.lt.s32.totalorder %s566_s5, %s560_s26 }
 0x154   : > { %p562_p3 = pnand %p561_p2, %p832_p6 }
 0x155   : > { %p569_p10 = por %p568_p5, %p567_p1 }
 0x156   : > { %p563_p4 = pneg %p562_p3 }
 0x158   : > { %p570_p11 = pnand %p569_p10, %p563_p4 }
 0x15a   : > { %573 = shalt.err (!%p570_p11)
}
 0x15b   : > { %s574_s27 = scalar_lea.hbm %s878_s2, 16 }
 0x15c   : > { %p575_p0 = scmp.ne.s32.totalorder %s878_s2, %s574_s27  ;;  %p580_p13 = scmp.lt.u32.totalorder %s574_s27, %s878_s2 }
 0x15e   : > { %p576_p12 = pnand %p575_p0, %p832_p6 }
 0x160   : > { %p577_p8 = pneg %p576_p12 }
 0x162   : > { %p582_p7 = pnand %p580_p13, %p577_p8 }
 0x164   : > { %585 = shalt.err (!%p582_p7)
}
 0x165   : > { %427 = dma.vmem_to_hbm [thread:$0]  (%p832_p6), %s313_s30, 16, %s878_s2, [#allocation5]  }
 0x166   : > { %619 = dma.done.wait (%p832_p6), [#allocation5], 16  }
 0x167   : > { %621 = vsyncadd (%p832_p6), [#allocation5], 4294967280 }
 0x168 PF: > { %s19_s14 = sadd.s32 1, %s644_s14   ;;  %s889_s9 = smov %s628_s10 }
 0x169   : > { %p16_p9 = scmp.ge.s32.totalorder %s19_s14, 4   ;;  %s890_s10 = smov %s632_s11 }
 0x16a   : > { %s891_s11 = smov %s716_s21  ;;  %s892_s12 = smov %s640_s13 }
 0x16b   : > { %s893_s13 = smov %s895_s16  ;;  %18 = sbr.rel (!%p16_p9) target bundleno = 7 (0x7), region = 86 }
 0x172   :  { %325 = vsyncpa [#allocation4], 1 }
 0x173   :  { %327 = vsyncpa [#allocation4 + $0x1], 1 }
 0x174   :  { %328 = vsyncpa [#allocation7], 1 }
 0x175   :  { %330 = vsyncpa [#allocation7 + $0x1], 1 }
 0x176   :  { %331 = vsyncpa [#allocation5], 1 }
 0x177   :  { %333 = vsyncpa [#allocation5 + $0x1], 1 }

</bundles_post_ra>
